<compile_context>
chip_gen: v7x
topology: tpu7x:2x2x1
jax: 0.10.0
libtpu: 0.0.40
codegen_flags: <defaults>
</compile_context>

<pallas_src>
import jax
import jax.numpy as jnp
from jax.experimental import pallas as pl
from jax.experimental.pallas import tpu as pltpu

# Small, forward-implied synthetic sizes.
VOCAB = 64      # synthetic vocabulary size
HIDDEN = 32     # embedding / sentence-embedding dim (real)
SEQ = 8         # max tokens per sentence
BATCH = 2       # number of sentences (real)

# TPU-friendly padded sizes (lane-dense output: one (8,128) f32 vreg).
B_PAD = 8       # batch rows padded to a full sublane group
H_PAD = 128     # hidden padded to a full lane group


def _encode_kernel(ids_ref, mask_ref, emb_ref, w_ref, b_ref, out_ref):
    """Single-invocation kernel (whole tiny problem is VMEM/SMEM resident).

    ids_ref  : SMEM [B_PAD, SEQ]   int32    token ids (padded rows unused)
    mask_ref : SMEM [B_PAD, SEQ]   float32  1.0 real token / 0.0 padding
    emb_ref  : VMEM [VOCAB, H_PAD] bfloat16 token-embedding table (zero-padded)
    w_ref    : VMEM [H_PAD, H_PAD] float32  dense head weight (zero-padded)
    b_ref    : VMEM [1, H_PAD]     float32  dense head bias (zero-padded)
    out_ref  : VMEM [B_PAD, H_PAD] float32  L2-normalized sentence embeddings
    """
    row_iota = jax.lax.broadcasted_iota(jnp.int32, (B_PAD, VOCAB), 0)
    voc_iota = jax.lax.broadcasted_iota(jnp.int32, (B_PAD, VOCAB), 1)
    row_col = jax.lax.broadcasted_iota(jnp.int32, (B_PAD, 1), 0)

    # Build the fused gather/pooling operand:
    #   counts[b, v] = sum_s onehot(ids[b,s] == v) * mask[b,s]
    #   msum[b]      = sum_s mask[b,s]
    # Driven by SMEM scalar reads; accumulation is purely in vregs
    # (one [8,128]-padded tile), so S never appears in a vector-shaped
    # intermediate.  Static unroll: BATCH * SEQ = 16 trivial iterations.
    counts = jnp.zeros((B_PAD, VOCAB), jnp.float32)
    msum = jnp.zeros((B_PAD, 1), jnp.float32)
    for b in range(BATCH):
        for s in range(SEQ):
            tok = ids_ref[b, s]          # scalar int32 from SMEM
            m = mask_ref[b, s]           # scalar f32 from SMEM
            hit = (row_iota == b) & (voc_iota == tok)
            counts = counts + jnp.where(hit, m, 0.0)
            msum = msum + jnp.where(row_col == b, m, 0.0)

    # Guard against an all-padding sentence (msum == 0).
    inv_len = 1.0 / jnp.maximum(msum, 1.0)                     # [B_PAD, 1] f32

    # Fused embedding gather + masked mean pooling:
    # one [B,V] @ [V,H] MXU matmul, bf16 operands, f32 accumulation.
    # `counts` holds small integers -> exact in bf16 (lossless gather).
    pooled = jnp.dot(counts.astype(jnp.bfloat16), emb_ref[...],
                     preferred_element_type=jnp.float32) * inv_len   # [B_PAD, H_PAD]

    # Dense head (kept f32: tiny matmul, keeps tight parity with reference).
    proj = jnp.dot(pooled, w_ref[...],
                   preferred_element_type=jnp.float32) + b_ref[...]  # [B_PAD, H_PAD]

    # L2 normalization (padded lanes are exactly zero, so the norm over
    # H_PAD equals the norm over the real HIDDEN lanes).
    ss = jnp.sum(proj * proj, axis=1, keepdims=True)                 # [B_PAD, 1]
    inv_norm = jax.lax.rsqrt(jnp.maximum(ss, 1e-30))
    out_ref[...] = proj * inv_norm


def pallas_encode(token_ids, mask, emb_table, w_dense, b_dense):
    """Pad to TPU-friendly shapes, run the kernel once, slice padding off."""
    B, S = token_ids.shape

    ids_p = jnp.zeros((B_PAD, SEQ), jnp.int32).at[:B, :S].set(token_ids)
    mask_p = jnp.zeros((B_PAD, SEQ), jnp.float32).at[:B, :S].set(mask)
    emb_p = jnp.zeros((VOCAB, H_PAD), jnp.bfloat16).at[:, :HIDDEN].set(emb_table)
    w_p = jnp.zeros((H_PAD, H_PAD), jnp.float32).at[:HIDDEN, :HIDDEN].set(w_dense)
    b_p = jnp.zeros((1, H_PAD), jnp.float32).at[:, :HIDDEN].set(b_dense)

    smem = pl.BlockSpec(memory_space=pltpu.MemorySpace.SMEM)
    vmem = pl.BlockSpec(memory_space=pltpu.MemorySpace.VMEM)

    out = pl.pallas_call(
        _encode_kernel,
        out_shape=jax.ShapeDtypeStruct((B_PAD, H_PAD), jnp.float32),
        in_specs=[smem, smem, vmem, vmem, vmem],
        out_specs=vmem,
    )(ids_p, mask_p, emb_p, w_p, b_p)

    return out[:B, :HIDDEN]


# ----------------------------- glue (no Pallas) -----------------------------

def tokenize(sentences):
    """Deterministic toy tokenizer: word -> hash -> vocab id, pad to SEQ."""
    # TODO(synk): real subword tokenization of strings has no Pallas equivalent.
    ids_list, mask_list = [], []
    for s in sentences:
        words = s.lower().split()[:SEQ]
        tok = [sum(ord(c) for c in w) % VOCAB for w in words]
        m = [1.0] * len(tok)
        tok += [0] * (SEQ - len(tok))
        m += [0.0] * (SEQ - len(m))
        ids_list.append(tok)
        mask_list.append(m)
    return jnp.array(ids_list, dtype=jnp.int32), jnp.array(mask_list, dtype=jnp.float32)


def reference_encode(token_ids, mask, emb_table, w_dense, b_dense):
    """Plain-JAX reference (uses the same bf16-stored embedding table)."""
    emb = emb_table.astype(jnp.float32)
    x = emb[token_ids]                                               # [B, S, H]
    denom = jnp.maximum(mask.sum(1, keepdims=True), 1.0)
    pooled = (x * mask[:, :, None]).sum(1) / denom
    proj = pooled @ w_dense + b_dense
    return proj / jnp.linalg.norm(proj, axis=1, keepdims=True)


if __name__ == "__main__":
    key = jax.random.PRNGKey(0)
    k_emb, k_w, k_b = jax.random.split(key, 3)

    # Deterministic synthetic parameters (stand-in for the SentenceTransformer).
    # Embedding table stored in bf16 (serving precision); dense head in f32.
    emb_table = (jax.random.normal(k_emb, (VOCAB, HIDDEN), dtype=jnp.float32)
                 * 0.1).astype(jnp.bfloat16)
    w_dense = jax.random.normal(k_w, (HIDDEN, HIDDEN), dtype=jnp.float32) * 0.1
    b_dense = jax.random.normal(k_b, (1, HIDDEN), dtype=jnp.float32) * 0.01

    sentences = ["the quick brown fox jumps", "pallas kernels on tpu are fun"]
    token_ids, mask = tokenize(sentences)

    out = pallas_encode(token_ids, mask, emb_table, w_dense, b_dense)
    out = jax.block_until_ready(out)

    ref = reference_encode(token_ids, mask, emb_table, w_dense, b_dense)
    assert out.shape == (BATCH, HIDDEN) and out.dtype == jnp.float32
    assert jnp.allclose(out, ref, atol=1e-5, rtol=1e-5), float(jnp.max(jnp.abs(out - ref)))

    print("KERNEL_OK")
</pallas_src>

<mosaic_0001>
module attributes {stable_mosaic.version = 11 : i64} {
  func.func @_encode_kernel(%arg0: memref<8x8xi32, #tpu.memory_space<smem>>, %arg1: memref<8x8xf32, #tpu.memory_space<smem>>, %arg2: memref<64x128xbf16, #tpu.memory_space<vmem>>, %arg3: memref<128x128xf32, #tpu.memory_space<vmem>>, %arg4: memref<1x128xf32, #tpu.memory_space<vmem>>, %arg5: memref<8x128xf32, #tpu.memory_space<vmem>>) attributes {dimension_semantics = [], scalar_prefetch = 0 : i64, scratch_operands = 0 : i64, tpu.core_type = #tpu.core_type<tc>} {
    %0 = tpu.iota {dimensions = array<i32: 0>} : vector<8x64xi32>
    %1 = tpu.iota {dimensions = array<i32: 1>} : vector<8x64xi32>
    %2 = tpu.iota {dimensions = array<i32: 0>} : vector<8x1xi32>
    %cst = arith.constant 0.000000e+00 : f32
    %3 = vector.broadcast %cst : f32 to vector<8x64xf32>
    %cst_0 = arith.constant 0.000000e+00 : f32
    %4 = vector.broadcast %cst_0 : f32 to vector<8x1xf32>
    %c0 = arith.constant 0 : index
    %c0_1 = arith.constant 0 : index
    %5 = memref.load %arg0[%c0, %c0_1] : memref<8x8xi32, #tpu.memory_space<smem>>
    %c0_2 = arith.constant 0 : index
    %c0_3 = arith.constant 0 : index
    %6 = memref.load %arg1[%c0_2, %c0_3] : memref<8x8xf32, #tpu.memory_space<smem>>
    %c0_i32 = arith.constant 0 : i32
    %7 = vector.broadcast %c0_i32 : i32 to vector<8x64xi32>
    %8 = arith.cmpi eq, %0, %7 : vector<8x64xi32>
    %9 = vector.broadcast %5 : i32 to vector<8x64xi32>
    %10 = arith.cmpi eq, %1, %9 : vector<8x64xi32>
    %11 = arith.andi %8, %10 : vector<8x64xi1>
    %cst_4 = arith.constant 0.000000e+00 : f32
    %12 = vector.broadcast %6 : f32 to vector<8x64xf32>
    %13 = vector.broadcast %cst_4 : f32 to vector<8x64xf32>
    %14 = arith.select %11, %12, %13 : vector<8x64xi1>, vector<8x64xf32>
    %15 = arith.addf %3, %14 : vector<8x64xf32>
    %c0_i32_5 = arith.constant 0 : i32
    %16 = vector.broadcast %c0_i32_5 : i32 to vector<8x1xi32>
    %17 = arith.cmpi eq, %2, %16 : vector<8x1xi32>
    %cst_6 = arith.constant 0.000000e+00 : f32
    %18 = vector.broadcast %6 : f32 to vector<8x1xf32>
    %19 = vector.broadcast %cst_6 : f32 to vector<8x1xf32>
    %20 = arith.select %17, %18, %19 : vector<8x1xi1>, vector<8x1xf32>
    %21 = arith.addf %4, %20 : vector<8x1xf32>
    %c0_7 = arith.constant 0 : index
    %c1 = arith.constant 1 : index
    %22 = memref.load %arg0[%c0_7, %c1] : memref<8x8xi32, #tpu.memory_space<smem>>
    %c0_8 = arith.constant 0 : index
    %c1_9 = arith.constant 1 : index
    %23 = memref.load %arg1[%c0_8, %c1_9] : memref<8x8xf32, #tpu.memory_space<smem>>
    %c0_i32_10 = arith.constant 0 : i32
    %24 = vector.broadcast %c0_i32_10 : i32 to vector<8x64xi32>
    %25 = arith.cmpi eq, %0, %24 : vector<8x64xi32>
    %26 = vector.broadcast %22 : i32 to vector<8x64xi32>
    %27 = arith.cmpi eq, %1, %26 : vector<8x64xi32>
    %28 = arith.andi %25, %27 : vector<8x64xi1>
    %cst_11 = arith.constant 0.000000e+00 : f32
    %29 = vector.broadcast %23 : f32 to vector<8x64xf32>
    %30 = vector.broadcast %cst_11 : f32 to vector<8x64xf32>
    %31 = arith.select %28, %29, %30 : vector<8x64xi1>, vector<8x64xf32>
    %32 = arith.addf %15, %31 : vector<8x64xf32>
    %c0_i32_12 = arith.constant 0 : i32
    %33 = vector.broadcast %c0_i32_12 : i32 to vector<8x1xi32>
    %34 = arith.cmpi eq, %2, %33 : vector<8x1xi32>
    %cst_13 = arith.constant 0.000000e+00 : f32
    %35 = vector.broadcast %23 : f32 to vector<8x1xf32>
    %36 = vector.broadcast %cst_13 : f32 to vector<8x1xf32>
    %37 = arith.select %34, %35, %36 : vector<8x1xi1>, vector<8x1xf32>
    %38 = arith.addf %21, %37 : vector<8x1xf32>
    %c0_14 = arith.constant 0 : index
    %c2 = arith.constant 2 : index
    %39 = memref.load %arg0[%c0_14, %c2] : memref<8x8xi32, #tpu.memory_space<smem>>
    %c0_15 = arith.constant 0 : index
    %c2_16 = arith.constant 2 : index
    %40 = memref.load %arg1[%c0_15, %c2_16] : memref<8x8xf32, #tpu.memory_space<smem>>
    %c0_i32_17 = arith.constant 0 : i32
    %41 = vector.broadcast %c0_i32_17 : i32 to vector<8x64xi32>
    %42 = arith.cmpi eq, %0, %41 : vector<8x64xi32>
    %43 = vector.broadcast %39 : i32 to vector<8x64xi32>
    %44 = arith.cmpi eq, %1, %43 : vector<8x64xi32>
    %45 = arith.andi %42, %44 : vector<8x64xi1>
    %cst_18 = arith.constant 0.000000e+00 : f32
    %46 = vector.broadcast %40 : f32 to vector<8x64xf32>
    %47 = vector.broadcast %cst_18 : f32 to vector<8x64xf32>
    %48 = arith.select %45, %46, %47 : vector<8x64xi1>, vector<8x64xf32>
    %49 = arith.addf %32, %48 : vector<8x64xf32>
    %c0_i32_19 = arith.constant 0 : i32
    %50 = vector.broadcast %c0_i32_19 : i32 to vector<8x1xi32>
    %51 = arith.cmpi eq, %2, %50 : vector<8x1xi32>
    %cst_20 = arith.constant 0.000000e+00 : f32
    %52 = vector.broadcast %40 : f32 to vector<8x1xf32>
    %53 = vector.broadcast %cst_20 : f32 to vector<8x1xf32>
    %54 = arith.select %51, %52, %53 : vector<8x1xi1>, vector<8x1xf32>
    %55 = arith.addf %38, %54 : vector<8x1xf32>
    %c0_21 = arith.constant 0 : index
    %c3 = arith.constant 3 : index
    %56 = memref.load %arg0[%c0_21, %c3] : memref<8x8xi32, #tpu.memory_space<smem>>
    %c0_22 = arith.constant 0 : index
    %c3_23 = arith.constant 3 : index
    %57 = memref.load %arg1[%c0_22, %c3_23] : memref<8x8xf32, #tpu.memory_space<smem>>
    %c0_i32_24 = arith.constant 0 : i32
    %58 = vector.broadcast %c0_i32_24 : i32 to vector<8x64xi32>
    %59 = arith.cmpi eq, %0, %58 : vector<8x64xi32>
    %60 = vector.broadcast %56 : i32 to vector<8x64xi32>
    %61 = arith.cmpi eq, %1, %60 : vector<8x64xi32>
    %62 = arith.andi %59, %61 : vector<8x64xi1>
    %cst_25 = arith.constant 0.000000e+00 : f32
    %63 = vector.broadcast %57 : f32 to vector<8x64xf32>
    %64 = vector.broadcast %cst_25 : f32 to vector<8x64xf32>
    %65 = arith.select %62, %63, %64 : vector<8x64xi1>, vector<8x64xf32>
    %66 = arith.addf %49, %65 : vector<8x64xf32>
    %c0_i32_26 = arith.constant 0 : i32
    %67 = vector.broadcast %c0_i32_26 : i32 to vector<8x1xi32>
    %68 = arith.cmpi eq, %2, %67 : vector<8x1xi32>
    %cst_27 = arith.constant 0.000000e+00 : f32
    %69 = vector.broadcast %57 : f32 to vector<8x1xf32>
    %70 = vector.broadcast %cst_27 : f32 to vector<8x1xf32>
    %71 = arith.select %68, %69, %70 : vector<8x1xi1>, vector<8x1xf32>
    %72 = arith.addf %55, %71 : vector<8x1xf32>
    %c0_28 = arith.constant 0 : index
    %c4 = arith.constant 4 : index
    %73 = memref.load %arg0[%c0_28, %c4] : memref<8x8xi32, #tpu.memory_space<smem>>
    %c0_29 = arith.constant 0 : index
    %c4_30 = arith.constant 4 : index
    %74 = memref.load %arg1[%c0_29, %c4_30] : memref<8x8xf32, #tpu.memory_space<smem>>
    %c0_i32_31 = arith.constant 0 : i32
    %75 = vector.broadcast %c0_i32_31 : i32 to vector<8x64xi32>
    %76 = arith.cmpi eq, %0, %75 : vector<8x64xi32>
    %77 = vector.broadcast %73 : i32 to vector<8x64xi32>
    %78 = arith.cmpi eq, %1, %77 : vector<8x64xi32>
    %79 = arith.andi %76, %78 : vector<8x64xi1>
    %cst_32 = arith.constant 0.000000e+00 : f32
    %80 = vector.broadcast %74 : f32 to vector<8x64xf32>
    %81 = vector.broadcast %cst_32 : f32 to vector<8x64xf32>
    %82 = arith.select %79, %80, %81 : vector<8x64xi1>, vector<8x64xf32>
    %83 = arith.addf %66, %82 : vector<8x64xf32>
    %c0_i32_33 = arith.constant 0 : i32
    %84 = vector.broadcast %c0_i32_33 : i32 to vector<8x1xi32>
    %85 = arith.cmpi eq, %2, %84 : vector<8x1xi32>
    %cst_34 = arith.constant 0.000000e+00 : f32
    %86 = vector.broadcast %74 : f32 to vector<8x1xf32>
    %87 = vector.broadcast %cst_34 : f32 to vector<8x1xf32>
    %88 = arith.select %85, %86, %87 : vector<8x1xi1>, vector<8x1xf32>
    %89 = arith.addf %72, %88 : vector<8x1xf32>
    %c0_35 = arith.constant 0 : index
    %c5 = arith.constant 5 : index
    %90 = memref.load %arg0[%c0_35, %c5] : memref<8x8xi32, #tpu.memory_space<smem>>
    %c0_36 = arith.constant 0 : index
    %c5_37 = arith.constant 5 : index
    %91 = memref.load %arg1[%c0_36, %c5_37] : memref<8x8xf32, #tpu.memory_space<smem>>
    %c0_i32_38 = arith.constant 0 : i32
    %92 = vector.broadcast %c0_i32_38 : i32 to vector<8x64xi32>
    %93 = arith.cmpi eq, %0, %92 : vector<8x64xi32>
    %94 = vector.broadcast %90 : i32 to vector<8x64xi32>
    %95 = arith.cmpi eq, %1, %94 : vector<8x64xi32>
    %96 = arith.andi %93, %95 : vector<8x64xi1>
    %cst_39 = arith.constant 0.000000e+00 : f32
    %97 = vector.broadcast %91 : f32 to vector<8x64xf32>
    %98 = vector.broadcast %cst_39 : f32 to vector<8x64xf32>
    %99 = arith.select %96, %97, %98 : vector<8x64xi1>, vector<8x64xf32>
    %100 = arith.addf %83, %99 : vector<8x64xf32>
    %c0_i32_40 = arith.constant 0 : i32
    %101 = vector.broadcast %c0_i32_40 : i32 to vector<8x1xi32>
    %102 = arith.cmpi eq, %2, %101 : vector<8x1xi32>
    %cst_41 = arith.constant 0.000000e+00 : f32
    %103 = vector.broadcast %91 : f32 to vector<8x1xf32>
    %104 = vector.broadcast %cst_41 : f32 to vector<8x1xf32>
    %105 = arith.select %102, %103, %104 : vector<8x1xi1>, vector<8x1xf32>
    %106 = arith.addf %89, %105 : vector<8x1xf32>
    %c0_42 = arith.constant 0 : index
    %c6 = arith.constant 6 : index
    %107 = memref.load %arg0[%c0_42, %c6] : memref<8x8xi32, #tpu.memory_space<smem>>
    %c0_43 = arith.constant 0 : index
    %c6_44 = arith.constant 6 : index
    %108 = memref.load %arg1[%c0_43, %c6_44] : memref<8x8xf32, #tpu.memory_space<smem>>
    %c0_i32_45 = arith.constant 0 : i32
    %109 = vector.broadcast %c0_i32_45 : i32 to vector<8x64xi32>
    %110 = arith.cmpi eq, %0, %109 : vector<8x64xi32>
    %111 = vector.broadcast %107 : i32 to vector<8x64xi32>
    %112 = arith.cmpi eq, %1, %111 : vector<8x64xi32>
    %113 = arith.andi %110, %112 : vector<8x64xi1>
    %cst_46 = arith.constant 0.000000e+00 : f32
    %114 = vector.broadcast %108 : f32 to vector<8x64xf32>
    %115 = vector.broadcast %cst_46 : f32 to vector<8x64xf32>
    %116 = arith.select %113, %114, %115 : vector<8x64xi1>, vector<8x64xf32>
    %117 = arith.addf %100, %116 : vector<8x64xf32>
    %c0_i32_47 = arith.constant 0 : i32
    %118 = vector.broadcast %c0_i32_47 : i32 to vector<8x1xi32>
    %119 = arith.cmpi eq, %2, %118 : vector<8x1xi32>
    %cst_48 = arith.constant 0.000000e+00 : f32
    %120 = vector.broadcast %108 : f32 to vector<8x1xf32>
    %121 = vector.broadcast %cst_48 : f32 to vector<8x1xf32>
    %122 = arith.select %119, %120, %121 : vector<8x1xi1>, vector<8x1xf32>
    %123 = arith.addf %106, %122 : vector<8x1xf32>
    %c0_49 = arith.constant 0 : index
    %c7 = arith.constant 7 : index
    %124 = memref.load %arg0[%c0_49, %c7] : memref<8x8xi32, #tpu.memory_space<smem>>
    %c0_50 = arith.constant 0 : index
    %c7_51 = arith.constant 7 : index
    %125 = memref.load %arg1[%c0_50, %c7_51] : memref<8x8xf32, #tpu.memory_space<smem>>
    %c0_i32_52 = arith.constant 0 : i32
    %126 = vector.broadcast %c0_i32_52 : i32 to vector<8x64xi32>
    %127 = arith.cmpi eq, %0, %126 : vector<8x64xi32>
    %128 = vector.broadcast %124 : i32 to vector<8x64xi32>
    %129 = arith.cmpi eq, %1, %128 : vector<8x64xi32>
    %130 = arith.andi %127, %129 : vector<8x64xi1>
    %cst_53 = arith.constant 0.000000e+00 : f32
    %131 = vector.broadcast %125 : f32 to vector<8x64xf32>
    %132 = vector.broadcast %cst_53 : f32 to vector<8x64xf32>
    %133 = arith.select %130, %131, %132 : vector<8x64xi1>, vector<8x64xf32>
    %134 = arith.addf %117, %133 : vector<8x64xf32>
    %c0_i32_54 = arith.constant 0 : i32
    %135 = vector.broadcast %c0_i32_54 : i32 to vector<8x1xi32>
    %136 = arith.cmpi eq, %2, %135 : vector<8x1xi32>
    %cst_55 = arith.constant 0.000000e+00 : f32
    %137 = vector.broadcast %125 : f32 to vector<8x1xf32>
    %138 = vector.broadcast %cst_55 : f32 to vector<8x1xf32>
    %139 = arith.select %136, %137, %138 : vector<8x1xi1>, vector<8x1xf32>
    %140 = arith.addf %123, %139 : vector<8x1xf32>
    %c1_56 = arith.constant 1 : index
    %c0_57 = arith.constant 0 : index
    %141 = memref.load %arg0[%c1_56, %c0_57] : memref<8x8xi32, #tpu.memory_space<smem>>
    %c1_58 = arith.constant 1 : index
    %c0_59 = arith.constant 0 : index
    %142 = memref.load %arg1[%c1_58, %c0_59] : memref<8x8xf32, #tpu.memory_space<smem>>
    %c1_i32 = arith.constant 1 : i32
    %143 = vector.broadcast %c1_i32 : i32 to vector<8x64xi32>
    %144 = arith.cmpi eq, %0, %143 : vector<8x64xi32>
    %145 = vector.broadcast %141 : i32 to vector<8x64xi32>
    %146 = arith.cmpi eq, %1, %145 : vector<8x64xi32>
    %147 = arith.andi %144, %146 : vector<8x64xi1>
    %cst_60 = arith.constant 0.000000e+00 : f32
    %148 = vector.broadcast %142 : f32 to vector<8x64xf32>
    %149 = vector.broadcast %cst_60 : f32 to vector<8x64xf32>
    %150 = arith.select %147, %148, %149 : vector<8x64xi1>, vector<8x64xf32>
    %151 = arith.addf %134, %150 : vector<8x64xf32>
    %c1_i32_61 = arith.constant 1 : i32
    %152 = vector.broadcast %c1_i32_61 : i32 to vector<8x1xi32>
    %153 = arith.cmpi eq, %2, %152 : vector<8x1xi32>
    %cst_62 = arith.constant 0.000000e+00 : f32
    %154 = vector.broadcast %142 : f32 to vector<8x1xf32>
    %155 = vector.broadcast %cst_62 : f32 to vector<8x1xf32>
    %156 = arith.select %153, %154, %155 : vector<8x1xi1>, vector<8x1xf32>
    %157 = arith.addf %140, %156 : vector<8x1xf32>
    %c1_63 = arith.constant 1 : index
    %c1_64 = arith.constant 1 : index
    %158 = memref.load %arg0[%c1_63, %c1_64] : memref<8x8xi32, #tpu.memory_space<smem>>
    %c1_65 = arith.constant 1 : index
    %c1_66 = arith.constant 1 : index
    %159 = memref.load %arg1[%c1_65, %c1_66] : memref<8x8xf32, #tpu.memory_space<smem>>
    %c1_i32_67 = arith.constant 1 : i32
    %160 = vector.broadcast %c1_i32_67 : i32 to vector<8x64xi32>
    %161 = arith.cmpi eq, %0, %160 : vector<8x64xi32>
    %162 = vector.broadcast %158 : i32 to vector<8x64xi32>
    %163 = arith.cmpi eq, %1, %162 : vector<8x64xi32>
    %164 = arith.andi %161, %163 : vector<8x64xi1>
    %cst_68 = arith.constant 0.000000e+00 : f32
    %165 = vector.broadcast %159 : f32 to vector<8x64xf32>
    %166 = vector.broadcast %cst_68 : f32 to vector<8x64xf32>
    %167 = arith.select %164, %165, %166 : vector<8x64xi1>, vector<8x64xf32>
    %168 = arith.addf %151, %167 : vector<8x64xf32>
    %c1_i32_69 = arith.constant 1 : i32
    %169 = vector.broadcast %c1_i32_69 : i32 to vector<8x1xi32>
    %170 = arith.cmpi eq, %2, %169 : vector<8x1xi32>
    %cst_70 = arith.constant 0.000000e+00 : f32
    %171 = vector.broadcast %159 : f32 to vector<8x1xf32>
    %172 = vector.broadcast %cst_70 : f32 to vector<8x1xf32>
    %173 = arith.select %170, %171, %172 : vector<8x1xi1>, vector<8x1xf32>
    %174 = arith.addf %157, %173 : vector<8x1xf32>
    %c1_71 = arith.constant 1 : index
    %c2_72 = arith.constant 2 : index
    %175 = memref.load %arg0[%c1_71, %c2_72] : memref<8x8xi32, #tpu.memory_space<smem>>
    %c1_73 = arith.constant 1 : index
    %c2_74 = arith.constant 2 : index
    %176 = memref.load %arg1[%c1_73, %c2_74] : memref<8x8xf32, #tpu.memory_space<smem>>
    %c1_i32_75 = arith.constant 1 : i32
    %177 = vector.broadcast %c1_i32_75 : i32 to vector<8x64xi32>
    %178 = arith.cmpi eq, %0, %177 : vector<8x64xi32>
    %179 = vector.broadcast %175 : i32 to vector<8x64xi32>
    %180 = arith.cmpi eq, %1, %179 : vector<8x64xi32>
    %181 = arith.andi %178, %180 : vector<8x64xi1>
    %cst_76 = arith.constant 0.000000e+00 : f32
    %182 = vector.broadcast %176 : f32 to vector<8x64xf32>
    %183 = vector.broadcast %cst_76 : f32 to vector<8x64xf32>
    %184 = arith.select %181, %182, %183 : vector<8x64xi1>, vector<8x64xf32>
    %185 = arith.addf %168, %184 : vector<8x64xf32>
    %c1_i32_77 = arith.constant 1 : i32
    %186 = vector.broadcast %c1_i32_77 : i32 to vector<8x1xi32>
    %187 = arith.cmpi eq, %2, %186 : vector<8x1xi32>
    %cst_78 = arith.constant 0.000000e+00 : f32
    %188 = vector.broadcast %176 : f32 to vector<8x1xf32>
    %189 = vector.broadcast %cst_78 : f32 to vector<8x1xf32>
    %190 = arith.select %187, %188, %189 : vector<8x1xi1>, vector<8x1xf32>
    %191 = arith.addf %174, %190 : vector<8x1xf32>
    %c1_79 = arith.constant 1 : index
    %c3_80 = arith.constant 3 : index
    %192 = memref.load %arg0[%c1_79, %c3_80] : memref<8x8xi32, #tpu.memory_space<smem>>
    %c1_81 = arith.constant 1 : index
    %c3_82 = arith.constant 3 : index
    %193 = memref.load %arg1[%c1_81, %c3_82] : memref<8x8xf32, #tpu.memory_space<smem>>
    %c1_i32_83 = arith.constant 1 : i32
    %194 = vector.broadcast %c1_i32_83 : i32 to vector<8x64xi32>
    %195 = arith.cmpi eq, %0, %194 : vector<8x64xi32>
    %196 = vector.broadcast %192 : i32 to vector<8x64xi32>
    %197 = arith.cmpi eq, %1, %196 : vector<8x64xi32>
    %198 = arith.andi %195, %197 : vector<8x64xi1>
    %cst_84 = arith.constant 0.000000e+00 : f32
    %199 = vector.broadcast %193 : f32 to vector<8x64xf32>
    %200 = vector.broadcast %cst_84 : f32 to vector<8x64xf32>
    %201 = arith.select %198, %199, %200 : vector<8x64xi1>, vector<8x64xf32>
    %202 = arith.addf %185, %201 : vector<8x64xf32>
    %c1_i32_85 = arith.constant 1 : i32
    %203 = vector.broadcast %c1_i32_85 : i32 to vector<8x1xi32>
    %204 = arith.cmpi eq, %2, %203 : vector<8x1xi32>
    %cst_86 = arith.constant 0.000000e+00 : f32
    %205 = vector.broadcast %193 : f32 to vector<8x1xf32>
    %206 = vector.broadcast %cst_86 : f32 to vector<8x1xf32>
    %207 = arith.select %204, %205, %206 : vector<8x1xi1>, vector<8x1xf32>
    %208 = arith.addf %191, %207 : vector<8x1xf32>
    %c1_87 = arith.constant 1 : index
    %c4_88 = arith.constant 4 : index
    %209 = memref.load %arg0[%c1_87, %c4_88] : memref<8x8xi32, #tpu.memory_space<smem>>
    %c1_89 = arith.constant 1 : index
    %c4_90 = arith.constant 4 : index
    %210 = memref.load %arg1[%c1_89, %c4_90] : memref<8x8xf32, #tpu.memory_space<smem>>
    %c1_i32_91 = arith.constant 1 : i32
    %211 = vector.broadcast %c1_i32_91 : i32 to vector<8x64xi32>
    %212 = arith.cmpi eq, %0, %211 : vector<8x64xi32>
    %213 = vector.broadcast %209 : i32 to vector<8x64xi32>
    %214 = arith.cmpi eq, %1, %213 : vector<8x64xi32>
    %215 = arith.andi %212, %214 : vector<8x64xi1>
    %cst_92 = arith.constant 0.000000e+00 : f32
    %216 = vector.broadcast %210 : f32 to vector<8x64xf32>
    %217 = vector.broadcast %cst_92 : f32 to vector<8x64xf32>
    %218 = arith.select %215, %216, %217 : vector<8x64xi1>, vector<8x64xf32>
    %219 = arith.addf %202, %218 : vector<8x64xf32>
    %c1_i32_93 = arith.constant 1 : i32
    %220 = vector.broadcast %c1_i32_93 : i32 to vector<8x1xi32>
    %221 = arith.cmpi eq, %2, %220 : vector<8x1xi32>
    %cst_94 = arith.constant 0.000000e+00 : f32
    %222 = vector.broadcast %210 : f32 to vector<8x1xf32>
    %223 = vector.broadcast %cst_94 : f32 to vector<8x1xf32>
    %224 = arith.select %221, %222, %223 : vector<8x1xi1>, vector<8x1xf32>
    %225 = arith.addf %208, %224 : vector<8x1xf32>
    %c1_95 = arith.constant 1 : index
    %c5_96 = arith.constant 5 : index
    %226 = memref.load %arg0[%c1_95, %c5_96] : memref<8x8xi32, #tpu.memory_space<smem>>
    %c1_97 = arith.constant 1 : index
    %c5_98 = arith.constant 5 : index
    %227 = memref.load %arg1[%c1_97, %c5_98] : memref<8x8xf32, #tpu.memory_space<smem>>
    %c1_i32_99 = arith.constant 1 : i32
    %228 = vector.broadcast %c1_i32_99 : i32 to vector<8x64xi32>
    %229 = arith.cmpi eq, %0, %228 : vector<8x64xi32>
    %230 = vector.broadcast %226 : i32 to vector<8x64xi32>
    %231 = arith.cmpi eq, %1, %230 : vector<8x64xi32>
    %232 = arith.andi %229, %231 : vector<8x64xi1>
    %cst_100 = arith.constant 0.000000e+00 : f32
    %233 = vector.broadcast %227 : f32 to vector<8x64xf32>
    %234 = vector.broadcast %cst_100 : f32 to vector<8x64xf32>
    %235 = arith.select %232, %233, %234 : vector<8x64xi1>, vector<8x64xf32>
    %236 = arith.addf %219, %235 : vector<8x64xf32>
    %c1_i32_101 = arith.constant 1 : i32
    %237 = vector.broadcast %c1_i32_101 : i32 to vector<8x1xi32>
    %238 = arith.cmpi eq, %2, %237 : vector<8x1xi32>
    %cst_102 = arith.constant 0.000000e+00 : f32
    %239 = vector.broadcast %227 : f32 to vector<8x1xf32>
    %240 = vector.broadcast %cst_102 : f32 to vector<8x1xf32>
    %241 = arith.select %238, %239, %240 : vector<8x1xi1>, vector<8x1xf32>
    %242 = arith.addf %225, %241 : vector<8x1xf32>
    %c1_103 = arith.constant 1 : index
    %c6_104 = arith.constant 6 : index
    %243 = memref.load %arg0[%c1_103, %c6_104] : memref<8x8xi32, #tpu.memory_space<smem>>
    %c1_105 = arith.constant 1 : index
    %c6_106 = arith.constant 6 : index
    %244 = memref.load %arg1[%c1_105, %c6_106] : memref<8x8xf32, #tpu.memory_space<smem>>
    %c1_i32_107 = arith.constant 1 : i32
    %245 = vector.broadcast %c1_i32_107 : i32 to vector<8x64xi32>
    %246 = arith.cmpi eq, %0, %245 : vector<8x64xi32>
    %247 = vector.broadcast %243 : i32 to vector<8x64xi32>
    %248 = arith.cmpi eq, %1, %247 : vector<8x64xi32>
    %249 = arith.andi %246, %248 : vector<8x64xi1>
    %cst_108 = arith.constant 0.000000e+00 : f32
    %250 = vector.broadcast %244 : f32 to vector<8x64xf32>
    %251 = vector.broadcast %cst_108 : f32 to vector<8x64xf32>
    %252 = arith.select %249, %250, %251 : vector<8x64xi1>, vector<8x64xf32>
    %253 = arith.addf %236, %252 : vector<8x64xf32>
    %c1_i32_109 = arith.constant 1 : i32
    %254 = vector.broadcast %c1_i32_109 : i32 to vector<8x1xi32>
    %255 = arith.cmpi eq, %2, %254 : vector<8x1xi32>
    %cst_110 = arith.constant 0.000000e+00 : f32
    %256 = vector.broadcast %244 : f32 to vector<8x1xf32>
    %257 = vector.broadcast %cst_110 : f32 to vector<8x1xf32>
    %258 = arith.select %255, %256, %257 : vector<8x1xi1>, vector<8x1xf32>
    %259 = arith.addf %242, %258 : vector<8x1xf32>
    %c1_111 = arith.constant 1 : index
    %c7_112 = arith.constant 7 : index
    %260 = memref.load %arg0[%c1_111, %c7_112] : memref<8x8xi32, #tpu.memory_space<smem>>
    %c1_113 = arith.constant 1 : index
    %c7_114 = arith.constant 7 : index
    %261 = memref.load %arg1[%c1_113, %c7_114] : memref<8x8xf32, #tpu.memory_space<smem>>
    %c1_i32_115 = arith.constant 1 : i32
    %262 = vector.broadcast %c1_i32_115 : i32 to vector<8x64xi32>
    %263 = arith.cmpi eq, %0, %262 : vector<8x64xi32>
    %264 = vector.broadcast %260 : i32 to vector<8x64xi32>
    %265 = arith.cmpi eq, %1, %264 : vector<8x64xi32>
    %266 = arith.andi %263, %265 : vector<8x64xi1>
    %cst_116 = arith.constant 0.000000e+00 : f32
    %267 = vector.broadcast %261 : f32 to vector<8x64xf32>
    %268 = vector.broadcast %cst_116 : f32 to vector<8x64xf32>
    %269 = arith.select %266, %267, %268 : vector<8x64xi1>, vector<8x64xf32>
    %270 = arith.addf %253, %269 : vector<8x64xf32>
    %c1_i32_117 = arith.constant 1 : i32
    %271 = vector.broadcast %c1_i32_117 : i32 to vector<8x1xi32>
    %272 = arith.cmpi eq, %2, %271 : vector<8x1xi32>
    %cst_118 = arith.constant 0.000000e+00 : f32
    %273 = vector.broadcast %261 : f32 to vector<8x1xf32>
    %274 = vector.broadcast %cst_118 : f32 to vector<8x1xf32>
    %275 = arith.select %272, %273, %274 : vector<8x1xi1>, vector<8x1xf32>
    %276 = arith.addf %259, %275 : vector<8x1xf32>
    %cst_119 = arith.constant 1.000000e+00 : f32
    %277 = vector.broadcast %cst_119 : f32 to vector<8x1xf32>
    %278 = arith.maximumf %276, %277 : vector<8x1xf32>
    %cst_120 = arith.constant 1.000000e+00 : f32
    %279 = vector.broadcast %cst_120 : f32 to vector<8x1xf32>
    %280 = arith.divf %279, %278 : vector<8x1xf32>
    %281 = arith.truncf %270 : vector<8x64xf32> to vector<8x64xbf16>
    %c0_121 = arith.constant 0 : index
    %c0_122 = arith.constant 0 : index
    %282 = vector.load %arg2[%c0_121, %c0_122] : memref<64x128xbf16, #tpu.memory_space<vmem>>, vector<64x128xbf16>
    %cst_123 = arith.constant dense<0.000000e+00> : vector<8x128xf32>
    %283 = tpu.matmul %281, %282, %cst_123 {dimension_numbers = #tpu.dot_dimension_numbers<[1], [0], [0], [1], [0, 0, 1, 1], [], []>} : vector<8x64xbf16>, vector<64x128xbf16>, vector<8x128xf32> -> vector<8x128xf32>
    %284 = vector.broadcast %280 : vector<8x1xf32> to vector<8x128xf32>
    %285 = arith.mulf %283, %284 : vector<8x128xf32>
    %c0_124 = arith.constant 0 : index
    %c0_125 = arith.constant 0 : index
    %286 = vector.load %arg3[%c0_124, %c0_125] : memref<128x128xf32, #tpu.memory_space<vmem>>, vector<128x128xf32>
    %cst_126 = arith.constant dense<0.000000e+00> : vector<8x128xf32>
    %287 = tpu.matmul %285, %286, %cst_126 {dimension_numbers = #tpu.dot_dimension_numbers<[1], [0], [0], [1], [0, 0, 1, 1], [], []>} : vector<8x128xf32>, vector<128x128xf32>, vector<8x128xf32> -> vector<8x128xf32>
    %c0_127 = arith.constant 0 : index
    %c0_128 = arith.constant 0 : index
    %288 = vector.load %arg4[%c0_127, %c0_128] : memref<1x128xf32, #tpu.memory_space<vmem>>, vector<1x128xf32>
    %289 = vector.broadcast %288 : vector<1x128xf32> to vector<8x128xf32>
    %290 = arith.addf %287, %289 : vector<8x128xf32>
    %291 = arith.mulf %290, %290 : vector<8x128xf32>
    %cst_129 = arith.constant dense<0.000000e+00> : vector<8xf32>
    %292 = vector.multi_reduction <add>, %291, %cst_129 [1] : vector<8x128xf32> to vector<8xf32>
    %293 = vector.shape_cast %292 : vector<8xf32> to vector<8x1xf32>
    %cst_130 = arith.constant 1.000000e-30 : f32
    %294 = vector.broadcast %cst_130 : f32 to vector<8x1xf32>
    %295 = arith.maximumf %293, %294 : vector<8x1xf32>
    %296 = math.rsqrt %295 : vector<8x1xf32>
    %297 = vector.broadcast %296 : vector<8x1xf32> to vector<8x128xf32>
    %298 = arith.mulf %290, %297 : vector<8x128xf32>
    %c0_131 = arith.constant 0 : index
    %c0_132 = arith.constant 0 : index
    %299 = vector.load %arg5[%c0_131, %c0_132] : memref<8x128xf32, #tpu.memory_space<vmem>>, vector<8x128xf32>
    tpu.vector_store %arg5[%c0_131, %c0_132], %298 {strides = array<i32>} : memref<8x128xf32, #tpu.memory_space<vmem>>, vector<8x128xf32>,
    return
  }
}

</mosaic_0001>

<bundles_post_ra>
// kernel: tpu_custom_call.1
= control target key start
LH: loop header
LB: loop body
LE: loop exit
PB: predicated region body
PF: predicated region fallthrough
CT: control target
= control target key end

     0   :  { %10 = vsyncpa [#allocation5], 0  ;;  %s994_s0 = inlined_call_operand.hbm [shape: s32[8,8], index: 0, kind: input, shape index: {}]   ;;  %s995_s1 = inlined_call_operand.hbm [shape: f32[8,8], index: 1, kind: input, shape index: {}]   ;;  %s996_s2 = inlined_call_operand.hbm [shape: bf16[64,128], index: 2, kind: input, shape index: {}]   ;;  %s997_s3 = inlined_call_operand.hbm [shape: f32[128,128], index: 3, kind: input, shape index: {}]   ;;  %s998_s4 = inlined_call_operand.vmem [shape: f32[1,128], index: 4, kind: input, shape index: {}]   ;;  %s999_s5 = inlined_call_operand.hbm [shape: f32[8,128], index: 5, kind: output, shape index: {}]  }
   0x1   :  { %11 = vsyncpa [#allocation7], 0 }
   0x2   :  { %12 = vsyncpa [#allocation3], 0 }
   0x3   :  { %13 = vsyncpa [#allocation10], 0 }
   0x4   :  { %14 = vsyncpa [#allocation4], 0  ;;  %s585_s20 = scalar_lea.hbm %s994_s0, 128 }
   0x5   :  { %p586_p0 = scmp.ne.s32.totalorder %s994_s0, %s585_s20  ;;  %p589_p1 = scmp.lt.u32.totalorder %s585_s20, %s994_s0 }
   0x7   :  { %p591_p2 = pnand %p589_p1, %p586_p0 }
   0x9   :  { %594 = shalt.err (!%p591_p2)
}
   0xa   :  { %s681_s25 = smov [#allocation2]   ;;  %s595_s30 = scalar_lea.hbm %s995_s1, 128 }
   0xb   :  { %22 = dma.hbm_to_smem %s994_s0, 128, %s681_s25, [#allocation5]  }
   0xc   :  { %p596_p3 = scmp.ne.s32.totalorder %s995_s1, %s595_s30  ;;  %p599_p4 = scmp.lt.u32.totalorder %s595_s30, %s995_s1 }
   0xe   :  { %p601_p5 = pnand %p599_p4, %p596_p3 }
  0x10   :  { %604 = shalt.err (!%p601_p5)
}
  0x11   :  { %s682_s10 = smov [#allocation6]   ;;  %s683_s0 = smov [#allocation8]  }
  0x12   :  { %30 = dma.hbm_to_smem %s995_s1, 128, %s682_s10, [#allocation7]  }
  0x13   :  { %s36_s13 = sshll.u32 %s683_s0, 4  ;;  %s605_s16 = scalar_lea.hbm %s996_s2, 512  ;;  %s37_s13 = int_to_ptr.vmem [resolvable:$true] %s36_s13 }
  0x14   :  { %p606_p6 = scmp.ne.s32.totalorder %s996_s2, %s605_s16  ;;  %p609_p7 = scmp.lt.u32.totalorder %s605_s16, %s996_s2 }
  0x16   :  { %p611_p8 = pnand %p609_p7, %p606_p6 }
  0x18   :  { %614 = shalt.err (!%p611_p8)
}
  0x19   :  { %s615_s21 = scalar_lea.vmem %s37_s13, 512  ;;  %p620_p10 = scmp.lt.s32.totalorder %s37_s13, %s37_s13 }
  0x1a   :  { %p616_p9 = scmp.ne.s32.totalorder %s37_s13, %s615_s21  ;;  %p621_p11 = scmp.lt.s32.totalorder %s615_s21, %s615_s21 }
  0x1c   :  { %p622_p12 = por %p621_p11, %p620_p10 }
  0x1e   :  { %p623_p13 = pnand %p622_p12, %p616_p9 }
  0x20   :  { %626 = shalt.err (!%p623_p13)
}
  0x21   :  { %s684_s1 = smov 64   ;;  %s685_s22 = smov 4  }
  0x22   :  { %42 = dma.hbm_to_vmem [thread:$0]  %s996_s2, 512, %s37_s13, [#allocation3], %s684_s1, %s684_s1, %s685_s22  }
  0x23   :  { %s686_s25 = smov [#allocation9]   ;;  %s627_s29 = scalar_lea.hbm %s997_s3, 2048 }
  0x24   :  { %s48_s26 = sshll.u32 %s686_s25, 4  ;;  %p628_p0 = scmp.ne.s32.totalorder %s997_s3, %s627_s29  ;;  %s49_s26 = int_to_ptr.vmem [resolvable:$true] %s48_s26 }
  0x25   :  { %p631_p1 = scmp.lt.u32.totalorder %s627_s29, %s997_s3 }
  0x27   :  { %p633_p2 = pnand %p631_p1, %p628_p0 }
  0x29   :  { %636 = shalt.err (!%p633_p2)
}
  0x2a   :  { %s637_s9 = scalar_lea.vmem %s49_s26, 2048  ;;  %p642_p4 = scmp.lt.s32.totalorder %s49_s26, %s49_s26 }
  0x2b   :  { %p638_p3 = scmp.ne.s32.totalorder %s49_s26, %s637_s9  ;;  %p643_p5 = scmp.lt.s32.totalorder %s637_s9, %s637_s9 }
  0x2d   :  { %p644_p6 = por %p643_p5, %p642_p4 }
  0x2f   :  { %p645_p7 = pnand %p644_p6, %p638_p3 }
  0x31   :  { %648 = shalt.err (!%p645_p7)
}
  0x32   :  { %s687_s2 = smov 128   ;;  %s688_s10 = smov 8  }
  0x33   :  { %54 = dma.hbm_to_vmem [thread:$0]  %s997_s3, 2048, %s49_s26, [#allocation10], %s687_s2, %s687_s2, %s688_s10  }
  0x34   :  { %671 = dma.done.wait [#allocation5], 128  }
  0x35   :  { %672 = vsyncadd [#allocation5], 4294967168 }
  0x36   :  { %673 = dma.done.wait [#allocation7], 128  }
  0x37   :  { %674 = vsyncadd [#allocation7], 4294967168 }
  0x38   :  { %675 = dma.done.wait [#allocation3], 512  }
  0x39   :  { %676 = vsyncadd [#allocation3], 4294966784 }
  0x3a   :  { %677 = dma.done.wait [#allocation10], 2048  }
  0x3b   :  { %678 = vsyncadd [#allocation10], 4294965248 }
  0x3c   :  { %69 = sfence }
  0x3d   :  { %v577_v0 = vld [vmem:[#allocation8] sm:$0xff]   ;;  %v71_v1 = vlaneseq  ;;  %v689_v2 = vmov 0.0   ;;  %v578_v3 = vld [vmem:[#allocation8 + $0x8] sm:$0xff]   ;;  %vm690_vm0 = vmmov 0   ;;  %v579_v4 = vld [vmem:[#allocation8 + $0x10] sm:$0xff]   ;;  %s773_s3 = sld [smem:[#allocation2]] }
  0x3e   :  { %494 = vmatprep.subr.bf16.mxu0 %v689_v2  ;;  %502 = vmatprep.mubr.msk.bf16.mxu0 %vm690_vm0, %v689_v2  ;;  %s775_s0 = sld [smem:[#allocation6]]  ;;  %s779_s13 = sld [smem:[#allocation2 + $0x1]]  ;;  %v691_v7 = vmov 0.0|0.0   ;;  %v318_v8 = vld [vmem:[#allocation9] sm:$0xff]  ;;  %v319_v9 = vld [vmem:[#allocation9 + $0x8] sm:$0xff]  ;;  %v320_v11 = vld [vmem:[#allocation9 + $0x10] sm:$0xff] }
  0x3f   :  { %495 = vmatpush3.bf16.msra.mxu0 %v577_v0  ;;  %538 = vmatprep.mubr.msk.f32.mxu1 %vm690_vm0, %v689_v2  ;;  %v771_v5 = vshrl.u32 %v71_v1, 7  ;;  %v777_v6 = vand.u32 127, %v71_v1  ;;  %s781_s14 = sld [smem:[#allocation6 + $0x1]]  ;;  %s783_s15 = sld [smem:[#allocation2 + $0x2]]  ;;  %v542_v10 = vpack.c.bf16 %v319_v9, %v318_v8  ;;  %v321_v12 = vld [vmem:[#allocation9 + $0x18] sm:$0xff]  ;;  %v796_v13 = vld [vmem:[#allocation9 + $0x20] sm:$0xff] }
  0x40   :  { %496 = vmatprep.subr.bf16.mxu0 %v689_v2  ;;  %s785_s16 = sld [smem:[#allocation6 + $0x2]]  ;;  %541 = vmatprep.subr.bf16.mxu1 %v691_v7  ;;  %s788_s17 = sld [smem:[#allocation2 + $0x3]]  ;;  %v323_v14 = vld [vmem:[#allocation9 + $0x28] sm:$0xff]  ;;  %v545_v15 = vpack.c.bf16 %v321_v12, %v320_v11  ;;  %v801_v16 = vld [vmem:[#allocation9 + $0x30] sm:$0xff]  ;;  %v803_v17 = vld [vmem:[#allocation9 + $0x38] sm:$0xff] }
  0x41   :  { %s790_s18 = sld [smem:[#allocation6 + $0x3]]  ;;  %s792_s19 = sld [smem:[#allocation2 + $0x4]]  ;;  %vm77_vm1 = vcmp.eq.s32.totalorder %v771_v5, 0  ;;  %543 = vmatpush3.bf16.msra.mxu1 %v542_v10  ;;  %v580_v18 = vld [vmem:[#allocation8 + $0x18] sm:$0xff]   ;;  %v548_v21 = vpack.c.bf16 %v323_v14, %v796_v13  ;;  %v551_v22 = vpack.c.bf16 %v803_v17, %v801_v16  ;;  %vm158_vm7 = vcmp.eq.s32.totalorder %v771_v5, 1  ;;  %v332_v5 = vld [vmem:[#allocation9 + $0x70] sm:$0xff] }
  0x42   :  { %s794_s20 = sld [smem:[#allocation6 + $0x4]]  ;;  %s799_s21 = sld [smem:[#allocation2 + $0x5]]  ;;  %544 = vmatprep.subr.bf16.mxu1 %v691_v7 }
  0x43   :  { %497 = vmatpush3.bf16.msra.mxu0 %v578_v3  ;;  %v78_v19 = vstv %s773_s3  ;;  %s807_s1 = sld [smem:[#allocation6 + $0x5]]  ;;  %s809_s22 = sld [smem:[#allocation2 + $0x6]] }
  0x44   :  { %498 = vmatprep.subr.bf16.mxu0 %v689_v2  ;;  %v81_v20 = vstv %s775_s0  ;;  %vm79_vm2 = vcmp.eq.s32.totalorder %v777_v6, %v78_v19  ;;  %v88_v24 = vstv %s779_s13  ;;  %s820_s23 = sld [smem:[#allocation6 + $0x6]]  ;;  %s829_s24 = sld [smem:[#allocation2 + $0x7]] }
  0x45   :  { %v84_v23 = vsel %vm77_vm1, %v81_v20, 0.0  ;;  %v91_v25 = vstv %s781_s14  ;;  %vm80_vm3 = vmand %vm77_vm1, %vm79_vm2  ;;  %vm89_vm4 = vcmp.eq.s32.totalorder %v777_v6, %v88_v24  ;;  %v98_v27 = vstv %s783_s15  ;;  %s831_s25 = sld [smem:[#allocation6 + $0x7]]  ;;  %546 = vmatpush3.bf16.msra.mxu1 %v545_v15  ;;  %s844_s26 = sld [smem:[#allocation2 + $0x80]] }
  0x46   :  { %v94_v26 = vsel %vm77_vm1, %v91_v25, 0.0  ;;  %v101_v28 = vstv %s785_s16  ;;  %v82_v29 = vsel %vm80_vm3, %v81_v20, 0.0  ;;  %vm90_vm5 = vmand %vm77_vm1, %vm89_vm4  ;;  %vm99_vm6 = vcmp.eq.s32.totalorder %v777_v6, %v98_v27  ;;  %s846_s27 = sld [smem:[#allocation6 + $0x80]]  ;;  %547 = vmatprep.subr.bf16.mxu1 %v691_v7  ;;  %s850_s28 = sld [smem:[#allocation2 + $0x81]] }
  0x47   :  { %499 = vmatpush3.bf16.msra.mxu0 %v579_v4  ;;  %v95_v30 = vadd.f32 %v94_v26, %v84_v23  ;;  %v104_v31 = vsel %vm77_vm1, %v101_v28, 0.0  ;;  %v92_v32 = vsel %vm90_vm5, %v91_v25, 0.0  ;;  %vm100_vm8 = vmand %vm77_vm1, %vm99_vm6  ;;  %v108_v33 = vstv %s788_s17  ;;  %s859_s29 = sld [smem:[#allocation6 + $0x81]]  ;;  %s861_s30 = sld [smem:[#allocation2 + $0x82]] }
  0x48   :  { %500 = vmatprep.subr.bf16.mxu0 %v689_v2  ;;  %v111_v34 = vstv %s790_s18  ;;  %v118_v35 = vstv %s792_s19  ;;  %v93_v36 = vadd.f32 %v92_v32, %v82_v29  ;;  %v102_v37 = vsel %vm100_vm8, %v101_v28, 0.0  ;;  %s870_s6 = sld [smem:[#allocation6 + $0x82]]  ;;  %s872_s7 = sld [smem:[#allocation2 + $0x83]] }
  0x49   :  { %v105_v38 = vadd.f32 %v104_v31, %v95_v30  ;;  %vm109_vm9 = vcmp.eq.s32.totalorder %v777_v6, %v108_v33  ;;  %v114_v39 = vsel %vm77_vm1, %v111_v34, 0.0  ;;  %vm119_vm11 = vcmp.eq.s32.totalorder %v777_v6, %v118_v35  ;;  %549 = vmatpush3.bf16.msra.mxu1 %v548_v21  ;;  %s885_s8 = sld [smem:[#allocation6 + $0x83]]  ;;  %s887_s9 = sld [smem:[#allocation2 + $0x84]]  ;;  %v326_v33 = vld [vmem:[#allocation9 + $0x40] sm:$0xff] }
  0x4a   :  { %vm110_vm10 = vmand %vm77_vm1, %vm109_vm9  ;;  %v121_v40 = vstv %s794_s20  ;;  %v128_v41 = vstv %s799_s21  ;;  %v103_v42 = vadd.f32 %v102_v37, %v93_v36  ;;  %v131_v47 = vstv %s807_s1  ;;  %550 = vmatprep.subr.bf16.mxu1 %v691_v7  ;;  %s899_s2 = sld [smem:[#allocation6 + $0x84]]  ;;  %s901_s10 = sld [smem:[#allocation2 + $0x85]] }
  0x4b   :  { %501 = vmatpush3.bf16.msra.mxu0 %v580_v18  ;;  %v112_v43 = vsel %vm110_vm10, %v111_v34, 0.0  ;;  %v115_v44 = vadd.f32 %v114_v39, %v105_v38  ;;  %vm120_vm12 = vmand %vm77_vm1, %vm119_vm11  ;;  %v124_v45 = vsel %vm77_vm1, %v121_v40, 0.0  ;;  %vm129_vm13 = vcmp.eq.s32.totalorder %v777_v6, %v128_v41  ;;  %s909_s11 = sld [smem:[#allocation6 + $0x85]]  ;;  %s916_s12 = sld [smem:[#allocation2 + $0x86]]  ;;  %v327_v34 = vld [vmem:[#allocation9 + $0x48] sm:$0xff]  ;;  %v328_v41 = vld [vmem:[#allocation9 + $0x50] sm:$0xff] }
  0x4c   :  { %v122_v46 = vsel %vm120_vm12, %v121_v40, 0.0  ;;  %v138_v48 = vstv %s809_s22  ;;  %v113_v49 = vadd.f32 %v112_v43, %v103_v42  ;;  %vm130_vm14 = vmand %vm77_vm1, %vm129_vm13  ;;  %v134_v51 = vsel %vm77_vm1, %v131_v47, 0.0  ;;  %s918_s3 = sld [smem:[#allocation6 + $0x86]]  ;;  %s928_s0 = sld [smem:[#allocation2 + $0x87]]  ;;  %v329_v42 = vld [vmem:[#allocation9 + $0x58] sm:$0xff] }
  0x4d   :  { %v125_v50 = vadd.f32 %v124_v45, %v115_v44  ;;  %vm139_vm15 = vcmp.eq.s32.totalorder %v777_v6, %v138_v48  ;;  %v132_v52 = vsel %vm130_vm14, %v131_v47, 0.0  ;;  %v141_v53 = vstv %s820_s23  ;;  %552 = vmatpush3.bf16.msra.mxu1 %v551_v22  ;;  %s934_s13 = sld [smem:[#allocation6 + $0x87]]  ;;  %s692_s16 = smov [#allocation11]  }
  0x4e   :  { %vm140_vm0 = vmand %vm77_vm1, %vm139_vm15  ;;  %v148_v54 = vstv %s829_s24  ;;  %v151_v55 = vstv %s831_s25  ;;  %v123_v56 = vadd.f32 %v122_v46, %v113_v49  ;;  %v144_v59 = vsel %vm77_vm1, %v141_v53, 0.0  ;;  %553 = vmatprep.subr.bf16.mxu1 %v691_v7  ;;  %s424_s17 = sshll.u32 %s692_s16, 4  ;;  %s425_s17 = int_to_ptr.vmem [resolvable:$true] %s424_s17 }
  0x4f   :  { %v135_v57 = vadd.f32 %v134_v51, %v125_v50  ;;  %v142_v58 = vsel %vm140_vm0, %v141_v53, 0.0  ;;  %vm149_vm2 = vcmp.eq.s32.totalorder %v777_v6, %v148_v54  ;;  %v154_v60 = vsel %vm77_vm1, %v151_v55, 0.0  ;;  %v330_v54 = vld [vmem:[#allocation9 + $0x60] sm:$0xff]  ;;  %s649_s18 = scalar_lea.vmem %s425_s17, 128  ;;  %p654_p9 = scmp.lt.s32.totalorder %s425_s17, %s425_s17 }
  0x50   :  { %v159_v61 = vstv %s844_s26  ;;  %v162_v62 = vstv %s846_s27  ;;  %v133_v63 = vadd.f32 %v132_v52, %v123_v56  ;;  %vm150_vm3 = vmand %vm77_vm1, %vm149_vm2  ;;  %v169_v3 = vstv %s850_s28  ;;  %p650_p8 = scmp.ne.s32.totalorder %s425_s17, %s649_s18  ;;  %p655_p10 = scmp.lt.s32.totalorder %s649_s18, %s649_s18 }
  0x51   :  { %v145_v0 = vadd.f32 %v144_v59, %v135_v57  ;;  %vm160_vm4 = vcmp.eq.s32.totalorder %v777_v6, %v159_v61  ;;  %v165_v1 = vsel %vm158_vm7, %v162_v62, 0.0  ;;  %v152_v2 = vsel %vm150_vm3, %v151_v55, 0.0  ;;  %v331_v55 = vld [vmem:[#allocation9 + $0x68] sm:$0xff] }
  0x52   :  { %vm161_vm5 = vmand %vm158_vm7, %vm160_vm4  ;;  %v172_v4 = vstv %s859_s29  ;;  %v179_v8 = vstv %s861_s30  ;;  %v143_v9 = vadd.f32 %v142_v58, %v133_v63  ;;  %vm170_vm1 = vcmp.eq.s32.totalorder %v777_v6, %v169_v3  ;;  %p656_p11 = por %p655_p10, %p654_p9 }
  0x53   :  { %v155_v10 = vadd.f32 %v154_v60, %v145_v0  ;;  %v163_v11 = vsel %vm161_vm5, %v162_v62, 0.0  ;;  %vm171_vm6 = vmand %vm158_vm7, %vm170_vm1  ;;  %v175_v12 = vsel %vm158_vm7, %v172_v4, 0.0  ;;  %vm180_vm8 = vcmp.eq.s32.totalorder %v777_v6, %v179_v8  ;;  %v333_v0 = vld [vmem:[#allocation9 + $0x78] sm:$0xff] }
  0x54   :  { %v182_v13 = vstv %s870_s6  ;;  %v189_v14 = vstv %s872_s7  ;;  %v153_v15 = vadd.f32 %v152_v2, %v143_v9  ;;  %vm181_vm9 = vmand %vm158_vm7, %vm180_vm8  ;;  %v173_v18 = vsel %vm171_vm6, %v172_v4, 0.0  ;;  %p657_p12 = pnand %p656_p11, %p650_p8 }
  0x55   :  { %v166_v16 = vadd.f32 %v165_v1, %v155_v10  ;;  %v185_v17 = vsel %vm158_vm7, %v182_v13, 0.0  ;;  %vm190_vm10 = vcmp.eq.s32.totalorder %v777_v6, %v189_v14  ;;  %v192_v19 = vstv %s885_s8 }
  0x56   :  { %v199_v20 = vstv %s887_s9  ;;  %v164_v21 = vadd.f32 %v163_v11, %v153_v15  ;;  %vm191_vm11 = vmand %vm158_vm7, %vm190_vm10  ;;  %v195_v23 = vsel %vm158_vm7, %v192_v19, 0.0  ;;  %v183_v24 = vsel %vm181_vm9, %v182_v13, 0.0 }
  0x57   :  { %v176_v22 = vadd.f32 %v175_v12, %v166_v16  ;;  %vm200_vm12 = vcmp.eq.s32.totalorder %v777_v6, %v199_v20  ;;  %v193_v25 = vsel %vm191_vm11, %v192_v19, 0.0  ;;  %v202_v26 = vstv %s899_s2  ;;  %v471_v12 = vld [vmem:[%s998_s4] ss:$0 sm:$0xff] }
  0x58   :  { %v209_v27 = vstv %s901_s10  ;;  %v174_v28 = vadd.f32 %v173_v18, %v164_v21  ;;  %vm948_vm13 = vmand %vm158_vm7, %vm200_vm12  ;;  %v205_v31 = vsel %vm158_vm7, %v202_v26, 0.0  ;;  %v212_v32 = vstv %s909_s11 }
  0x59   :  { %v186_v29 = vadd.f32 %v185_v17, %v176_v22  ;;  %vm210_vm14 = vcmp.eq.s32.totalorder %v777_v6, %v209_v27  ;;  %v215_v35 = vsel %vm158_vm7, %v212_v32, 0.0  ;;  %v219_v36 = vstv %s916_s12 }
  0x5a   :  { %v222_v37 = vstv %s918_s3  ;;  %v184_v38 = vadd.f32 %v183_v24, %v174_v28  ;;  %vm211_vm15 = vmand %vm158_vm7, %vm210_vm14  ;;  %vm220_vm0 = vcmp.eq.s32.totalorder %v777_v6, %v219_v36  ;;  %v203_v43 = vsel %vm948_vm13, %v202_v26, 0.0 }
  0x5b   :  { %v196_v39 = vadd.f32 %v195_v23, %v186_v29  ;;  %v225_v40 = vsel %vm158_vm7, %v222_v37, 0.0  ;;  %v229_v44 = vstv %s928_s0  ;;  %v554_v45 = vpack.c.bf16 %v327_v34, %v326_v33  ;;  %vm221_vm2 = vmand %vm158_vm7, %vm220_vm0 }
  0x5c   :  { %v194_v46 = vadd.f32 %v193_v25, %v184_v38  ;;  %vm230_vm3 = vcmp.eq.s32.totalorder %v777_v6, %v229_v44  ;;  %v232_v48 = vstv %s934_s13  ;;  %v213_v49 = vsel %vm211_vm15, %v212_v32, 0.0 }
  0x5d   :  { %v206_v47 = vadd.f32 %v205_v31, %v196_v39  ;;  %v235_v50 = vsel %vm158_vm7, %v232_v48, 0.0  ;;  %555 = vmatpush3.bf16.msra.mxu1 %v554_v45  ;;  %v557_v51 = vpack.c.bf16 %v329_v42, %v328_v41  ;;  %vm231_vm4 = vmand %vm158_vm7, %vm230_vm3  ;;  %v223_v56 = vsel %vm221_vm2, %v222_v37, 0.0 }
  0x5e   :  { %v204_v52 = vadd.f32 %v203_v43, %v194_v46  ;;  %556 = vmatprep.subr.bf16.mxu1 %v691_v7  ;;  %v233_v6 = vsel %vm231_vm4, %v232_v48, 0.0  ;;  %v560_v59 = vpack.c.bf16 %v331_v55, %v330_v54  ;;  %vm273_vm5 = vcmask 523264  }
  0x5f   :  { %v216_v53 = vadd.f32 %v215_v35, %v206_v47  ;;  %v563_v1 = vpack.c.bf16 %v333_v0, %v332_v5 }
  0x60   :  { %v214_v57 = vadd.f32 %v213_v49, %v204_v52 }
  0x61   :  { %v226_v58 = vadd.f32 %v225_v40, %v216_v53  ;;  %558 = vmatpush3.bf16.msra.mxu1 %v557_v51 }
  0x62   :  { %v224_v60 = vadd.f32 %v223_v56, %v214_v57  ;;  %559 = vmatprep.subr.bf16.mxu1 %v691_v7 }
  0x63   :  { %v236_v61 = vadd.f32 %v235_v50, %v226_v58 }
  0x64   :  { %v234_v62 = vadd.f32 %v233_v6, %v224_v60 }
  0x65   :  { %561 = vmatpush3.bf16.msra.mxu1 %v560_v59  ;;  %v237_v2 = vmax.f32 %v236_v61, 1.0 }
  0x66   :  { %v240_v63 = vpack.c.bf16 %v234_v62, %v234_v62  ;;  %562 = vmatprep.subr.bf16.mxu1 %v691_v7 }
  0x67   :  { %581 = vrcp.f32 %v237_v2 }
  0x68   :  { %503 = vmatmul.mubr.msk.bf16.vlgmr.msra.gmra.mrb[0].mxu0 %vm273_vm5, %v240_v63 }
  0x69   :  { %564 = vmatpush3.bf16.msra.mxu1 %v563_v1 }
  0x71   :  { %v582_v3 = vpop.eup %581 }
 0x13b   :  { %v311_v4 = vpop.f32.mrb[0].mxu0 }
 0x13c   :  { %v317_v8 = vmul.f32 %v582_v3, %v311_v4  ;;  %v504_v9 = vpop.f32.mrb[1].mxu0 }
 0x13d   :  { %v314_v10 = vpop.f32.mrb[2].mxu0 }
 0x13e   :  { %v505_v11 = vpop.f32.mrb[3].mxu0  ;;  %539 = vmatmul.mubr.f32.vlgmr.msra.gmra.mrb[0].mxu1 %v317_v8 }
 0x211   :  { %v407_v13 = vpop.f32.mrb[0].mxu1 }
 0x212   :  { %v408_v7 = vadd.f32 %v471_v12, %v407_v13  ;;  %v540_v14 = vpop.f32.mrb[1].mxu1 }
 0x214   :  { %v411_v15 = vmul.f32 %v408_v7, %v408_v7 }
 0x216   :  { %412 = vadd.xlane.f32.xlu0 %v411_v15 }
 0x2a3   :  { %v413_v16 = vpop.xlane.xlu0 %412 }
 0x2a4   :  { %v414_v17 = vmax.f32 %v413_v16, 1e-30 }
 0x2a6   :  { %583 = vrsqrt.f32 %v414_v17 }
 0x2b0   :  { %v584_v18 = vpop.eup %583 }
 0x2b1   :  { %v416_v19 = vmul.f32 %v584_v18, %v408_v7 }
 0x2b3   :  { %417 = vst [vmem:[#allocation11] sm:$0xff] %v416_v19 }
 0x2b4   :  { %660 = shalt.err (!%p657_p12)
}
 0x2b5   :  { %s661_s20 = scalar_lea.hbm %s999_s5, 128 }
 0x2b6   :  { %p662_p13 = scmp.ne.s32.totalorder %s999_s5, %s661_s20  ;;  %p665_p0 = scmp.lt.u32.totalorder %s661_s20, %s999_s5 }
 0x2b8   :  { %p667_p1 = pnand %p665_p0, %p662_p13 }
 0x2ba   :  { %670 = shalt.err (!%p667_p1)
}
 0x2bb   :  { %427 = dma.vmem_to_hbm [thread:$0]  %s425_s17, 128, %s999_s5, [#allocation4]  }
 0x2bc   :  { %679 = dma.done.wait [#allocation4], 128  }
 0x2bd   :  { %680 = vsyncadd [#allocation4], 4294967168 }
 0x2be   :  { %431 = vsyncpa [#allocation3], 1 }
 0x2bf   :  { %432 = vsyncpa [#allocation10], 1 }
 0x2c0   :  { %433 = vsyncpa [#allocation4], 1 }
 0x2c1   :  { %434 = vsyncpa [#allocation5], 1 }
 0x2c2   :  { %435 = vsyncpa [#allocation7], 1 }

</bundles_post_ra>
